<compile_context>
chip_gen: v5e
topology: v5e:2x2
jax: 0.10.0
libtpu: 0.0.40
codegen_flags: <defaults>
</compile_context>

<pallas_src>
import jax
import jax.numpy as jnp
from jax.experimental import pallas as pl
from jax.experimental.pallas import tpu as pltpu

WADV = 1.0
WCON = 50.0
WENC = 1.0

LANES = 128
TILE_ROWS = 512  # (512,128) f32 tile = 256 KiB; x2 inputs x2 buffers ~= 1 MiB


def _to_slab(x):
    """Flatten to a (rows, 128) slab in the input's native dtype.

    When numel % 128 == 0 this is a pure reshape (no extra HBM traffic).
    Otherwise only the ragged tail is zero-padded to finish the last lane row;
    identical zero padding on both members of a pair contributes exactly 0 to
    every loss term, so no in-kernel mask is needed for the lane tail.
    """
    flat = jnp.ravel(x)
    n = flat.shape[0]
    rem = n % LANES
    if rem != 0:
        flat = jnp.pad(flat, (0, LANES - rem))
    return flat.reshape(flat.shape[0] // LANES, LANES), n


def _make_kernel(block_rows, acc_rows, rows_con, needs_mask):
    def kernel(scale_ref,            # SMEM (3,): [WENC/n_enc, WCON/n_con, WADV/n_adv]
               li_ref, lo_ref,       # VMEM resident latent slabs
               pr_ref, pf_ref,       # VMEM resident pred slabs
               im_ref, fk_ref,       # VMEM (block_rows,128) tiles of images/fake
               out_ref,              # SMEM (1,) f32 final loss
               acc_ref,              # VMEM (acc_rows,128) f32 L1 accumulator
               small_ref):           # SMEM (1,) f32 enc+adv partial
        i = pl.program_id(0)

        # ---- first iteration: zero accumulator, reduce the small terms once ----
        @pl.when(i == 0)
        def _():
            acc_ref[...] = jnp.zeros_like(acc_ref)

            d = li_ref[...].astype(jnp.float32) - lo_ref[...].astype(jnp.float32)
            ad = jnp.abs(d)
            sl1 = jnp.where(ad < 1.0, 0.5 * d * d, ad - 0.5)   # SmoothL1, beta=1
            enc = jnp.sum(sl1)

            da = pr_ref[...].astype(jnp.float32) - pf_ref[...].astype(jnp.float32)
            adv = jnp.sum(da * da)                              # MSE

            small_ref[0] = enc * scale_ref[0] + adv * scale_ref[2]

        # ---- every iteration: L1 contribution of this images/fake tile ----
        l1 = jnp.abs(im_ref[...].astype(jnp.float32)
                     - fk_ref[...].astype(jnp.float32))
        if needs_mask:
            # Last tile may overhang the slab; OOB rows hold unspecified data.
            row = jax.lax.broadcasted_iota(jnp.int32, (block_rows, LANES), 0)
            l1 = jnp.where(row < (rows_con - i * block_rows), l1, 0.0)

        if acc_rows == 8:
            # (T,128) -> (T//8, 8, 128): summing whole vregs, pure VALU adds;
            # the expensive cross-lane reduce is deferred to the epilogue.
            acc_ref[...] += l1.reshape(block_rows // 8, 8, LANES).sum(axis=0)
        else:
            acc_ref[...] += jnp.sum(l1, axis=0, keepdims=True)

        # ---- last iteration: single cross-lane reduce + weighted combine ----
        @pl.when(i == pl.num_programs(0) - 1)
        def _():
            out_ref[0] = small_ref[0] + jnp.sum(acc_ref[...]) * scale_ref[1]

    return kernel


@jax.jit
def generator_loss(latent_i, latent_o, images, fake, pred_real, pred_fake):
    li, n_enc = _to_slab(latent_i)
    lo, _ = _to_slab(latent_o)
    im, n_con = _to_slab(images)
    fk, _ = _to_slab(fake)
    pr, n_adv = _to_slab(pred_real)
    pf, _ = _to_slab(pred_fake)

    rows_con = im.shape[0]
    if rows_con <= TILE_ROWS:
        block_rows = rows_con           # full-extent block (always legal)
        num_tiles = 1
    else:
        block_rows = TILE_ROWS          # 512 % 8 == 0
        num_tiles = -(-rows_con // TILE_ROWS)
    needs_mask = (rows_con % block_rows) != 0
    acc_rows = 8 if (block_rows % 8 == 0) else 1

    # Loss weights folded into the per-term 1/N scales.
    scales = jnp.array([WENC / n_enc, WCON / n_con, WADV / n_adv],
                       dtype=jnp.float32)

    smem = pltpu.MemorySpace.SMEM
    vmem = pltpu.MemorySpace.VMEM

    def resident(slab):
        return pl.BlockSpec(slab.shape, lambda i: (0, 0), memory_space=vmem)

    kernel = _make_kernel(block_rows, acc_rows, rows_con, needs_mask)

    out = pl.pallas_call(
        kernel,
        out_shape=jax.ShapeDtypeStruct((1,), jnp.float32),
        grid=(num_tiles,),
        in_specs=[
            pl.BlockSpec((3,), lambda i: (0,), memory_space=smem),   # scales
            resident(li), resident(lo),                              # latent pair
            resident(pr), resident(pf),                              # pred pair
            pl.BlockSpec((block_rows, LANES), lambda i: (i, 0), memory_space=vmem),
            pl.BlockSpec((block_rows, LANES), lambda i: (i, 0), memory_space=vmem),
        ],
        out_specs=pl.BlockSpec((1,), lambda i: (0,), memory_space=smem),
        scratch_shapes=[
            pltpu.VMEM((acc_rows, LANES), jnp.float32),
            pltpu.SMEM((1,), jnp.float32),
        ],
        compiler_params=pltpu.CompilerParams(
            dimension_semantics=("arbitrary",),
            vmem_limit_bytes=32 * 1024 * 1024,
        ),
    )(scales, li, lo, pr, pf, im, fk)
    return out[0]


def _reference(latent_i, latent_o, images, fake, pred_real, pred_fake):
    d = (latent_i - latent_o).astype(jnp.float32)
    ad = jnp.abs(d)
    err_enc = jnp.mean(jnp.where(ad < 1.0, 0.5 * d * d, ad - 0.5))
    err_con = jnp.mean(jnp.abs((images - fake).astype(jnp.float32)))
    da = (pred_real - pred_fake).astype(jnp.float32)
    err_adv = jnp.mean(da * da)
    return err_adv * WADV + err_con * WCON + err_enc * WENC


if __name__ == "__main__":
    key = jax.random.PRNGKey(0)
    k = jax.random.split(key, 6)

    # GANomaly-style shapes, small but exercising every kernel path:
    #  - latents: 200 elems -> lane-tail zero-pad path
    #  - images : 2x3x112x112 = 75264 elems = 588 rows -> 2 tiles, partial last
    #  - preds  : 512 elems -> resident small slab, no pad
    latent_i = jax.random.normal(k[0], (2, 100, 1, 1), dtype=jnp.float32)
    latent_o = jax.random.normal(k[1], (2, 100, 1, 1), dtype=jnp.float32)
    images = jax.random.normal(k[2], (2, 3, 112, 112), dtype=jnp.float32)   # NCHW
    fake = jax.random.normal(k[3], (2, 3, 112, 112), dtype=jnp.float32)     # NCHW
    pred_real = jax.random.normal(k[4], (2, 256), dtype=jnp.float32)
    pred_fake = jax.random.normal(k[5], (2, 256), dtype=jnp.float32)

    loss = generator_loss(latent_i, latent_o, images, fake, pred_real, pred_fake)
    loss = jax.block_until_ready(loss)

    ref = _reference(latent_i, latent_o, images, fake, pred_real, pred_fake)
    assert jnp.allclose(loss, ref, rtol=1e-5, atol=1e-5), (loss, ref)

    print("KERNEL_OK")
</pallas_src>

<mosaic_0001>
module attributes {stable_mosaic.version = 11 : i64} {
  func.func @kernel(%arg0: i32, %arg1: memref<3xf32, #tpu.memory_space<smem>>, %arg2: memref<2x128xf32, #tpu.memory_space<vmem>>, %arg3: memref<2x128xf32, #tpu.memory_space<vmem>>, %arg4: memref<4x128xf32, #tpu.memory_space<vmem>>, %arg5: memref<4x128xf32, #tpu.memory_space<vmem>>, %arg6: memref<512x128xf32, #tpu.memory_space<vmem>>, %arg7: memref<512x128xf32, #tpu.memory_space<vmem>>, %arg8: memref<1xf32, #tpu.memory_space<smem>>, %arg9: memref<8x128xf32, #tpu.memory_space<vmem>>, %arg10: memref<1xf32, #tpu.memory_space<smem>>) attributes {dimension_semantics = [#tpu.dimension_semantics<arbitrary>], iteration_bounds = array<i64: 2>, scalar_prefetch = 0 : i64, scratch_operands = 2 : i64, tpu.core_type = #tpu.core_type<tc>, window_params = [{transform_indices = @transform_0, window_bounds = array<i64: 3>}, {pipeline_mode = #tpu.pipeline_mode<synchronous>, transform_indices = @transform_1, window_bounds = array<i64: 2, 128>}, {pipeline_mode = #tpu.pipeline_mode<synchronous>, transform_indices = @transform_2, window_bounds = array<i64: 2, 128>}, {pipeline_mode = #tpu.pipeline_mode<synchronous>, transform_indices = @transform_3, window_bounds = array<i64: 4, 128>}, {pipeline_mode = #tpu.pipeline_mode<synchronous>, transform_indices = @transform_4, window_bounds = array<i64: 4, 128>}, {transform_indices = @transform_5, window_bounds = array<i64: 512, 128>}, {transform_indices = @transform_6, window_bounds = array<i64: 512, 128>}, {transform_indices = @transform_7, window_bounds = array<i64: 1>}]} {
    %c0_i32 = arith.constant 0 : i32
    %0 = arith.cmpi eq, %arg0, %c0_i32 : i32
    %1 = arith.extui %0 : i1 to i32
    %c0_i32_0 = arith.constant 0 : i32
    %2 = arith.cmpi ne, %1, %c0_i32_0 : i32
    scf.if %2 {
      %cst_10 = arith.constant 0.000000e+00 : f32
      %22 = vector.broadcast %cst_10 : f32 to vector<8x128xf32>
      %c0_11 = arith.constant 0 : index
      %c0_12 = arith.constant 0 : index
      %23 = vector.load %arg9[%c0_11, %c0_12] : memref<8x128xf32, #tpu.memory_space<vmem>>, vector<8x128xf32>
      tpu.vector_store %arg9[%c0_11, %c0_12], %22 {strides = array<i32>} : memref<8x128xf32, #tpu.memory_space<vmem>>, vector<8x128xf32>,
      %c0_13 = arith.constant 0 : index
      %c0_14 = arith.constant 0 : index
      %24 = vector.load %arg2[%c0_13, %c0_14] : memref<2x128xf32, #tpu.memory_space<vmem>>, vector<2x128xf32>
      %c0_15 = arith.constant 0 : index
      %c0_16 = arith.constant 0 : index
      %25 = vector.load %arg3[%c0_15, %c0_16] : memref<2x128xf32, #tpu.memory_space<vmem>>, vector<2x128xf32>
      %26 = arith.subf %24, %25 : vector<2x128xf32>
      %27 = math.absf %26 : vector<2x128xf32>
      %cst_17 = arith.constant 1.000000e+00 : f32
      %28 = vector.broadcast %cst_17 : f32 to vector<2x128xf32>
      %29 = arith.cmpf olt, %27, %28 : vector<2x128xf32>
      %cst_18 = arith.constant 5.000000e-01 : f32
      %30 = vector.broadcast %cst_18 : f32 to vector<2x128xf32>
      %31 = arith.mulf %30, %26 : vector<2x128xf32>
      %32 = arith.mulf %31, %26 : vector<2x128xf32>
      %cst_19 = arith.constant 5.000000e-01 : f32
      %33 = vector.broadcast %cst_19 : f32 to vector<2x128xf32>
      %34 = arith.subf %27, %33 : vector<2x128xf32>
      %35 = arith.select %29, %32, %34 : vector<2x128xi1>, vector<2x128xf32>
      %36 = vector.shape_cast %35 : vector<2x128xf32> to vector<1x2x128xf32>
      %cst_20 = arith.constant dense<0.000000e+00> : vector<1xf32>
      %37 = vector.multi_reduction <add>, %36, %cst_20 [1, 2] : vector<1x2x128xf32> to vector<1xf32>
      %38 = vector.shape_cast %37 : vector<1xf32> to vector<1x1x1xf32>
      %39 = vector.extract %38[0, 0, 0] : f32 from vector<1x1x1xf32>
      %c0_21 = arith.constant 0 : index
      %c0_22 = arith.constant 0 : index
      %40 = vector.load %arg4[%c0_21, %c0_22] : memref<4x128xf32, #tpu.memory_space<vmem>>, vector<4x128xf32>
      %c0_23 = arith.constant 0 : index
      %c0_24 = arith.constant 0 : index
      %41 = vector.load %arg5[%c0_23, %c0_24] : memref<4x128xf32, #tpu.memory_space<vmem>>, vector<4x128xf32>
      %42 = arith.subf %40, %41 : vector<4x128xf32>
      %43 = arith.mulf %42, %42 : vector<4x128xf32>
      %44 = vector.shape_cast %43 : vector<4x128xf32> to vector<1x4x128xf32>
      %cst_25 = arith.constant dense<0.000000e+00> : vector<1xf32>
      %45 = vector.multi_reduction <add>, %44, %cst_25 [1, 2] : vector<1x4x128xf32> to vector<1xf32>
      %46 = vector.shape_cast %45 : vector<1xf32> to vector<1x1x1xf32>
      %47 = vector.extract %46[0, 0, 0] : f32 from vector<1x1x1xf32>
      %c0_26 = arith.constant 0 : index
      %48 = memref.load %arg1[%c0_26] : memref<3xf32, #tpu.memory_space<smem>>
      %49 = arith.mulf %39, %48 : f32
      %c2 = arith.constant 2 : index
      %50 = memref.load %arg1[%c2] : memref<3xf32, #tpu.memory_space<smem>>
      %51 = arith.mulf %47, %50 : f32
      %52 = arith.addf %49, %51 : f32
      %c0_27 = arith.constant 0 : index
      %53 = memref.load %arg10[%c0_27] : memref<1xf32, #tpu.memory_space<smem>>
      memref.store %52, %arg10[%c0_27] : memref<1xf32, #tpu.memory_space<smem>>
    } else {
    }
    %c0 = arith.constant 0 : index
    %c0_1 = arith.constant 0 : index
    %3 = vector.load %arg6[%c0, %c0_1] : memref<512x128xf32, #tpu.memory_space<vmem>>, vector<512x128xf32>
    %c0_2 = arith.constant 0 : index
    %c0_3 = arith.constant 0 : index
    %4 = vector.load %arg7[%c0_2, %c0_3] : memref<512x128xf32, #tpu.memory_space<vmem>>, vector<512x128xf32>
    %5 = arith.subf %3, %4 : vector<512x128xf32>
    %6 = math.absf %5 : vector<512x128xf32>
    %7 = tpu.iota {dimensions = array<i32: 0>} : vector<512x128xi32>
    %c512_i32 = arith.constant 512 : i32
    %8 = arith.muli %arg0, %c512_i32 : i32
    %c588_i32 = arith.constant 588 : i32
    %9 = arith.subi %c588_i32, %8 : i32
    %10 = vector.broadcast %9 : i32 to vector<512x128xi32>
    %11 = arith.cmpi slt, %7, %10 : vector<512x128xi32>
    %cst = arith.constant 0.000000e+00 : f32
    %12 = vector.broadcast %cst : f32 to vector<512x128xf32>
    %13 = arith.select %11, %6, %12 : vector<512x128xi1>, vector<512x128xf32>
    %c0_4 = arith.constant 0 : index
    %c0_5 = arith.constant 0 : index
    %14 = vector.load %arg9[%c0_4, %c0_5] : memref<8x128xf32, #tpu.memory_space<vmem>>, vector<8x128xf32>
    %15 = vector.shape_cast %13 : vector<512x128xf32> to vector<64x8x128xf32>
    %cst_6 = arith.constant dense<0.000000e+00> : vector<8x128xf32>
    %16 = vector.multi_reduction <add>, %15, %cst_6 [0] : vector<64x8x128xf32> to vector<8x128xf32>
    %17 = arith.addf %14, %16 : vector<8x128xf32>
    %c0_7 = arith.constant 0 : index
    %c0_8 = arith.constant 0 : index
    %18 = vector.load %arg9[%c0_7, %c0_8] : memref<8x128xf32, #tpu.memory_space<vmem>>, vector<8x128xf32>
    tpu.vector_store %arg9[%c0_7, %c0_8], %17 {strides = array<i32>} : memref<8x128xf32, #tpu.memory_space<vmem>>, vector<8x128xf32>,
    %c1_i32 = arith.constant 1 : i32
    %19 = arith.cmpi eq, %arg0, %c1_i32 : i32
    %20 = arith.extui %19 : i1 to i32
    %c0_i32_9 = arith.constant 0 : i32
    %21 = arith.cmpi ne, %20, %c0_i32_9 : i32
    scf.if %21 {
      %c0_10 = arith.constant 0 : index
      %22 = memref.load %arg10[%c0_10] : memref<1xf32, #tpu.memory_space<smem>>
      %c0_11 = arith.constant 0 : index
      %c0_12 = arith.constant 0 : index
      %23 = vector.load %arg9[%c0_11, %c0_12] : memref<8x128xf32, #tpu.memory_space<vmem>>, vector<8x128xf32>
      %24 = vector.shape_cast %23 : vector<8x128xf32> to vector<1x8x128xf32>
      %cst_13 = arith.constant dense<0.000000e+00> : vector<1xf32>
      %25 = vector.multi_reduction <add>, %24, %cst_13 [1, 2] : vector<1x8x128xf32> to vector<1xf32>
      %26 = vector.shape_cast %25 : vector<1xf32> to vector<1x1x1xf32>
      %27 = vector.extract %26[0, 0, 0] : f32 from vector<1x1x1xf32>
      %c1 = arith.constant 1 : index
      %28 = memref.load %arg1[%c1] : memref<3xf32, #tpu.memory_space<smem>>
      %29 = arith.mulf %27, %28 : f32
      %30 = arith.addf %22, %29 : f32
      %c0_14 = arith.constant 0 : index
      %31 = memref.load %arg8[%c0_14] : memref<1xf32, #tpu.memory_space<smem>>
      memref.store %30, %arg8[%c0_14] : memref<1xf32, #tpu.memory_space<smem>>
    } else {
    }
    return
  }
  func.func @transform_0(%arg0: i32) -> i32 {
    %c0_i32 = arith.constant 0 : i32
    %c0_i32_0 = arith.constant 0 : i32
    return %c0_i32 : i32
  }
  func.func @transform_1(%arg0: i32) -> (i32, i32) {
    %c0_i32 = arith.constant 0 : i32
    %c0_i32_0 = arith.constant 0 : i32
    %c0_i32_1 = arith.constant 0 : i32
    return %c0_i32, %c0_i32_0 : i32, i32
  }
  func.func @transform_2(%arg0: i32) -> (i32, i32) {
    %c0_i32 = arith.constant 0 : i32
    %c0_i32_0 = arith.constant 0 : i32
    %c0_i32_1 = arith.constant 0 : i32
    return %c0_i32, %c0_i32_0 : i32, i32
  }
  func.func @transform_3(%arg0: i32) -> (i32, i32) {
    %c0_i32 = arith.constant 0 : i32
    %c0_i32_0 = arith.constant 0 : i32
    %c0_i32_1 = arith.constant 0 : i32
    return %c0_i32, %c0_i32_0 : i32, i32
  }
  func.func @transform_4(%arg0: i32) -> (i32, i32) {
    %c0_i32 = arith.constant 0 : i32
    %c0_i32_0 = arith.constant 0 : i32
    %c0_i32_1 = arith.constant 0 : i32
    return %c0_i32, %c0_i32_0 : i32, i32
  }
  func.func @transform_5(%arg0: i32) -> (i32, i32) {
    %c0_i32 = arith.constant 0 : i32
    %c0_i32_0 = arith.constant 0 : i32
    return %arg0, %c0_i32 : i32, i32
  }
  func.func @transform_6(%arg0: i32) -> (i32, i32) {
    %c0_i32 = arith.constant 0 : i32
    %c0_i32_0 = arith.constant 0 : i32
    return %arg0, %c0_i32 : i32, i32
  }
  func.func @transform_7(%arg0: i32) -> i32 {
    %c0_i32 = arith.constant 0 : i32
    %c0_i32_0 = arith.constant 0 : i32
    return %c0_i32 : i32
  }
}

</mosaic_0001>

<bundles_post_ra>
// kernel: generator_loss.1
= control target key start
LH: loop header
LB: loop body
LE: loop exit
PB: predicated region body
PF: predicated region fallthrough
CT: control target
= control target key end

     0   :  { %12 = vsyncpa [#allocation6], 0  ;;  %s1449_s0 = inlined_call_operand.vmem [shape: f32[3], index: 0, kind: input, shape index: {}]   ;;  %s1450_s1 = inlined_call_operand.vmem [shape: f32[2,128], index: 1, kind: input, shape index: {}]   ;;  %s1451_s2 = inlined_call_operand.vmem [shape: f32[2,128], index: 2, kind: input, shape index: {}]   ;;  %s1452_s3 = inlined_call_operand.vmem [shape: f32[4,128], index: 3, kind: input, shape index: {}]   ;;  %s1453_s4 = inlined_call_operand.vmem [shape: f32[4,128], index: 4, kind: input, shape index: {}]   ;;  %s1454_s5 = inlined_call_operand.vmem [shape: f32[588,128], index: 5, kind: input, shape index: {}]   ;;  %s1455_s6 = inlined_call_operand.vmem [shape: f32[588,128], index: 6, kind: input, shape index: {}]   ;;  %s1456_s7 = inlined_call_operand.hbm [shape: f32[1], index: 7, kind: output, shape index: {}]  }
   0x1   :  { %13 = vsyncpa [#allocation5], 0  ;;  %s1140_s24 = smov 0  }
   0x2 LB: > { %s1146_s25 = sadd.s32 4294967295, %s1095_s24   ;;  %p1000_p0 = scmp.ge.s32.totalorder %s1095_s24, 1  ;;  %s1095_s24 = sphi %s1140_s24, %s19_s24  }
   0x3   : > { %p202_p1 = scmp.lt.s32.totalorder %s1095_s24, 3  ;;  %p1001_p2 = scmp.ne.s32.totalorder %s1146_s25, 0 }
   0x4   : > { %s214_s28 = sshll.u32 %s1449_s0, 4  ;;  %p1037_p4 = scmp.eq.s32.totalorder %s1146_s25, 0  ;;  %s215_s28 = int_to_ptr.vmem [resolvable:$true] %s214_s28 }
   0x5   : > { %p203_p3 = pnand %p1000_p0, %p202_p1  ;;  %s1097_s29 = smov [#allocation4]  }
   0x7   : > { %p1033_p5 = pneg %p203_p3  ;;  %273 = sbr.rel (%p203_p3) target bundleno = 556 (0x22c), region = 48 }
   0x9   : > { %p1034_p6 = pnand %p1037_p4, %p1033_p5 }
   0xb   : > { %1036 = dma.vmem_to_smem (!%p1034_p6), %s215_s28, 16, %s1097_s29, [#allocation6]  }
   0xc   : > { %1086 = dma.done.wait (%p1037_p4), [#allocation6], 16  }
   0xd   : > { %1088 = vsyncadd (%p1037_p4), [#allocation6], 4294967280 }
   0xe   : > { %280 = sfence }
   0xf   : > { %s1005_s30 = sshll.u32 %s1146_s25, 6  ;;  %s383_s23 = sld [smem:[#allocation4]] (!%p1001_p2) }
  0x10   : > { %p320_p7 = scmp.lt.s32.totalorder %s1005_s30, 73  ;;  %346 = sbr.rel (%p1001_p2) target bundleno = 222 (0xde), region = 56 }
  0x11   : > { %s1011_s26 = sld [smem:[#allocation4 + $0x2]] (!%p1001_p2) }
  0x12   : > { %s1458_s30 = smov (!%p320_p7, %s1005_s30), 73 }
  0x13   : > { %s1006_s8 = sshll.u32 %s1458_s30, 3 }
  0x14   : > { %s1159_s11 = scalar_lea.vmem %s1454_s5, %s1006_s8  ;;  %s1164_s14 = scalar_lea.vmem %s1455_s6, %s1006_s8 }
  0x15   : > { %v348_v0 = vld [vmem:[%s1450_s1] sm:$0x3]  ;;  %vm357_vm1 = vcmask 1041408   ;;  %vm372_vm2 = vcmask 1043456   ;;  %v1098_v14 = vmov 0.0  }
  0x16   : > { %v349_v1 = vld [vmem:[%s1451_s2] sm:$0x3]  ;;  %347 = vst [vmem:[#allocation2] sm:$0xff] %v1098_v14 }
  0x17   : > { %v350_v2 = vsub.f32 %v348_v0, %v349_v1  ;;  %v368_v3 = vld [vmem:[%s1452_s3] sm:$0xf] }
  0x18   : > { %v369_v6 = vld [vmem:[%s1453_s4] sm:$0xf] }
  0x19   : > { %v351_v4 = vand.u32 2147483647, %v350_v2  ;;  %v353_v5 = vmul.f32 0.5, %v350_v2  ;;  %v370_v9 = vsub.f32 %v368_v3, %v369_v6 }
  0x1b   : > { %vm352_vm0 = vcmp.lt.f32.partialorder %v351_v4, 1.0  ;;  %v354_v7 = vmul.f32 %v353_v5, %v350_v2  ;;  %v1010_v8 = vadd.f32 -0.5, %v351_v4  ;;  %v371_v12 = vmul.f32 %v370_v9, %v370_v9 }
  0x1d   : > { %v356_v10 = vsel %vm352_vm0, %v354_v7, %v1010_v8  ;;  %v373_v13 = vsel %vm372_vm2, %v371_v12, 0.0 }
  0x1e   : > { %v358_v11 = vsel %vm357_vm1, %v356_v10, 0.0 }
  0x1f   : > { %359 = vadd.xlane.f32.xlu0 %v358_v11 }
  0x27   : > { %374 = vadd.xlane.f32.xlu0 %v373_v13 }
  0x92   : > { %v360_v15 = vpop.xlane.xlu0 %359 }
  0x93   : > { %v361_v16 = vrot.slane %v360_v15, 4 }
  0x95   : > { %v362_v17 = vadd.f32 %v361_v16, %v360_v15 }
  0x97   : > { %v363_v18 = vrot.slane %v362_v17, 2 }
  0x99   : > { %v364_v19 = vadd.f32 %v363_v18, %v362_v17 }
  0x9a   : > { %v375_v20 = vpop.xlane.xlu0 %374 }
  0x9b   : > { %v376_v21 = vrot.slane %v375_v20, 4  ;;  %v365_v22 = vrot.slane %v364_v19, 1 }
  0x9d   : > { %v377_v23 = vadd.f32 %v376_v21, %v375_v20  ;;  %v366_v24 = vadd.f32 %v365_v22, %v364_v19 }
  0x9f   : > { %v378_v25 = vrot.slane %v377_v23, 2  ;;  %1019 = vpush %v366_v24 }
  0xa1   : > { %v379_v26 = vadd.f32 %v378_v25, %v377_v23 }
  0xa3   : > { %v380_v27 = vrot.slane %v379_v26, 1 }
  0xa5   : > { %v381_v28 = vadd.f32 %v380_v27, %v379_v26 }
  0xa7   : > { %1021 = vpush %v381_v28 }
  0xd0   : > { %s1020_s27 = spop %1019 }
  0xd1   : > { %s384_s28 = smul.f32 %s1020_s27, %s383_s23 }
  0xd8   : > { %s1022_s29 = spop %1021 }
  0xd9   : > { %s386_s30 = smul.f32 %s1022_s29, %s1011_s26 }
  0xdb   : > { %s387_s8 = sadd.f32 %s386_s30, %s384_s28 }
  0xdd   : > { %389 = sst [smem:[#allocation3]] %s387_s8 }
  0xde PF: > { %v646_v29 = vlaneseq  ;;  %v390_v30 = vld [vmem:[%s1159_s11] sm:$0xff]  ;;  %s1012_s9 = sshll.u32 %s1146_s25, 9  ;;  %v391_v31 = vld [vmem:[%s1159_s11 + $0x8] sm:$0xff]  ;;  %v392_v35 = vld [vmem:[%s1159_s11 + $0x10] sm:$0xff]  ;;  %p1013_p8 = scmp.ne.s32.totalorder %s1146_s25, 1 }
  0xdf   : > { %v454_v32 = vld [vmem:[%s1164_s14] sm:$0xff]  ;;  %v455_v33 = vld [vmem:[%s1164_s14 + $0x8] sm:$0xff]  ;;  %v456_v36 = vld [vmem:[%s1164_s14 + $0x10] sm:$0xff]  ;;  %s712_s10 = ssub.s32 588, %s1012_s9  ;;  %s912_s12 = sld [smem:[#allocation3]] (!%p1013_p8) }
  0xe0   : > { %v1185_v34 = vshrl.u32 %v646_v29, 7  ;;  %v518_v37 = vsub.f32 %v390_v30, %v454_v32  ;;  %v519_v38 = vsub.f32 %v391_v31, %v455_v33  ;;  %v393_v39 = vld [vmem:[%s1159_s11 + $0x18] sm:$0xff]  ;;  %v520_v42 = vsub.f32 %v392_v35, %v456_v36  ;;  %v394_v44 = vld [vmem:[%s1159_s11 + $0x20] sm:$0xff]  ;;  %v395_v50 = vld [vmem:[%s1159_s11 + $0x28] sm:$0xff] }
  0xe1   : > { %v457_v40 = vld [vmem:[%s1164_s14 + $0x18] sm:$0xff]  ;;  %v1192_v43 = vstv %s712_s10  ;;  %v458_v45 = vld [vmem:[%s1164_s14 + $0x20] sm:$0xff]  ;;  %v459_v51 = vld [vmem:[%s1164_s14 + $0x28] sm:$0xff] }
  0xe2   : > { %v648_v41 = vadd.s32 8, %v1185_v34  ;;  %v649_v46 = vadd.s32 16, %v1185_v34  ;;  %v521_v47 = vsub.f32 %v393_v39, %v457_v40  ;;  %v582_v48 = vand.u32 2147483647, %v518_v37  ;;  %v396_v55 = vld [vmem:[%s1159_s11 + $0x30] sm:$0xff]  ;;  %v397_v62 = vld [vmem:[%s1159_s11 + $0x38] sm:$0xff] }
  0xe3   : > { %v583_v49 = vand.u32 2147483647, %v519_v38  ;;  %v650_v52 = vadd.s32 24, %v1185_v34  ;;  %vm714_vm3 = vcmp.lt.s32.totalorder %v1185_v34, %v1192_v43  ;;  %v522_v53 = vsub.f32 %v394_v44, %v458_v45  ;;  %v460_v56 = vld [vmem:[%s1164_s14 + $0x30] sm:$0xff]  ;;  %v461_v63 = vld [vmem:[%s1164_s14 + $0x38] sm:$0xff]  ;;  %v398_v4 = vld [vmem:[%s1159_s11 + $0x40] sm:$0xff] }
  0xe4   : > { %vm715_vm4 = vcmp.lt.s32.totalorder %v648_v41, %v1192_v43  ;;  %v584_v54 = vand.u32 2147483647, %v520_v42  ;;  %v651_v57 = vadd.s32 32, %v1185_v34  ;;  %vm716_vm5 = vcmp.lt.s32.totalorder %v649_v46, %v1192_v43  ;;  %v462_v5 = vld [vmem:[%s1164_s14 + $0x40] sm:$0xff]  ;;  %v399_v11 = vld [vmem:[%s1159_s11 + $0x48] sm:$0xff]  ;;  %v400_v18 = vld [vmem:[%s1159_s11 + $0x50] sm:$0xff] }
  0xe5   : > { %v523_v58 = vsub.f32 %v395_v50, %v459_v51  ;;  %v585_v59 = vand.u32 2147483647, %v521_v47  ;;  %v778_v60 = vsel %vm714_vm3, %v582_v48, 0.0  ;;  %v779_v61 = vsel %vm715_vm4, %v583_v49, 0.0  ;;  %v463_v12 = vld [vmem:[%s1164_s14 + $0x48] sm:$0xff]  ;;  %v464_v19 = vld [vmem:[%s1164_s14 + $0x50] sm:$0xff] }
  0xe6   : > { %v652_v0 = vadd.s32 40, %v1185_v34  ;;  %vm717_vm6 = vcmp.lt.s32.totalorder %v650_v52, %v1192_v43  ;;  %v524_v1 = vsub.f32 %v396_v55, %v460_v56  ;;  %v586_v2 = vand.u32 2147483647, %v522_v53  ;;  %v401_v25 = vld [vmem:[%s1159_s11 + $0x58] sm:$0xff]  ;;  %v402_v32 = vld [vmem:[%s1159_s11 + $0x60] sm:$0xff]  ;;  %v403_v40 = vld [vmem:[%s1159_s11 + $0x68] sm:$0xff] }
  0xe7   : > { %v780_v3 = vsel %vm716_vm5, %v584_v54, 0.0  ;;  %v653_v6 = vadd.s32 48, %v1185_v34  ;;  %vm718_vm7 = vcmp.lt.s32.totalorder %v651_v57, %v1192_v43  ;;  %v843_v7 = vadd.f32 %v779_v61, %v778_v60  ;;  %v465_v26 = vld [vmem:[%s1164_s14 + $0x58] sm:$0xff]  ;;  %v466_v33 = vld [vmem:[%s1164_s14 + $0x60] sm:$0xff]  ;;  %v467_v41 = vld [vmem:[%s1164_s14 + $0x68] sm:$0xff] }
  0xe8   : > { %v525_v8 = vsub.f32 %v397_v62, %v461_v63  ;;  %v587_v9 = vand.u32 2147483647, %v523_v58  ;;  %v781_v10 = vsel %vm717_vm6, %v585_v59, 0.0  ;;  %v654_v13 = vadd.s32 56, %v1185_v34  ;;  %v404_v48 = vld [vmem:[%s1159_s11 + $0x70] sm:$0xff]  ;;  %v405_v55 = vld [vmem:[%s1159_s11 + $0x78] sm:$0xff] }
  0xe9   : > { %vm719_vm8 = vcmp.lt.s32.totalorder %v652_v0, %v1192_v43  ;;  %v844_v14 = vadd.f32 %v843_v7, %v780_v3  ;;  %v526_v15 = vsub.f32 %v398_v4, %v462_v5  ;;  %v588_v16 = vand.u32 2147483647, %v524_v1  ;;  %v468_v49 = vld [vmem:[%s1164_s14 + $0x70] sm:$0xff]  ;;  %v469_v56 = vld [vmem:[%s1164_s14 + $0x78] sm:$0xff]  ;;  %v406_v62 = vld [vmem:[%s1159_s11 + $0x80] sm:$0xff] }
  0xea   : > { %v782_v17 = vsel %vm718_vm7, %v586_v2, 0.0  ;;  %v655_v20 = vadd.s32 64, %v1185_v34  ;;  %vm720_vm9 = vcmp.lt.s32.totalorder %v653_v6, %v1192_v43  ;;  %v527_v22 = vsub.f32 %v399_v11, %v463_v12  ;;  %v470_v63 = vld [vmem:[%s1164_s14 + $0x80] sm:$0xff]  ;;  %v407_v5 = vld [vmem:[%s1159_s11 + $0x88] sm:$0xff]  ;;  %v408_v12 = vld [vmem:[%s1159_s11 + $0x90] sm:$0xff] }
  0xeb   : > { %v845_v21 = vadd.f32 %v844_v14, %v781_v10  ;;  %v589_v23 = vand.u32 2147483647, %v525_v8  ;;  %v783_v24 = vsel %vm719_vm8, %v587_v9, 0.0  ;;  %v656_v27 = vadd.s32 72, %v1185_v34  ;;  %v471_v6 = vld [vmem:[%s1164_s14 + $0x88] sm:$0xff] }
  0xec   : > { %vm721_vm10 = vcmp.lt.s32.totalorder %v654_v13, %v1192_v43  ;;  %v528_v29 = vsub.f32 %v400_v18, %v464_v19  ;;  %v590_v30 = vand.u32 2147483647, %v526_v15  ;;  %v784_v31 = vsel %vm720_vm9, %v588_v16, 0.0  ;;  %v472_v13 = vld [vmem:[%s1164_s14 + $0x90] sm:$0xff]  ;;  %v409_v19 = vld [vmem:[%s1159_s11 + $0x98] sm:$0xff] }
  0xed   : > { %v846_v28 = vadd.f32 %v845_v21, %v782_v17  ;;  %v657_v35 = vadd.s32 80, %v1185_v34  ;;  %vm722_vm11 = vcmp.lt.s32.totalorder %v655_v20, %v1192_v43  ;;  %v529_v37 = vsub.f32 %v401_v25, %v465_v26  ;;  %v473_v20 = vld [vmem:[%s1164_s14 + $0x98] sm:$0xff]  ;;  %v410_v26 = vld [vmem:[%s1159_s11 + $0xa0] sm:$0xff] }
  0xee   : > { %v591_v38 = vand.u32 2147483647, %v527_v22  ;;  %v785_v39 = vsel %vm721_vm10, %v589_v23, 0.0  ;;  %v658_v42 = vadd.s32 88, %v1185_v34  ;;  %vm723_vm12 = vcmp.lt.s32.totalorder %v656_v27, %v1192_v43  ;;  %v474_v27 = vld [vmem:[%s1164_s14 + $0xa0] sm:$0xff] }
  0xef   : > { %v847_v36 = vadd.f32 %v846_v28, %v783_v24  ;;  %v530_v45 = vsub.f32 %v402_v32, %v466_v33  ;;  %v592_v46 = vand.u32 2147483647, %v528_v29  ;;  %v786_v47 = vsel %vm722_vm11, %v590_v30, 0.0  ;;  %v411_v33 = vld [vmem:[%s1159_s11 + $0xa8] sm:$0xff] }
  0xf0   : > { %v659_v50 = vadd.s32 96, %v1185_v34  ;;  %vm724_vm13 = vcmp.lt.s32.totalorder %v657_v35, %v1192_v43  ;;  %v531_v52 = vsub.f32 %v403_v40, %v467_v41  ;;  %v593_v53 = vand.u32 2147483647, %v529_v37  ;;  %v475_v35 = vld [vmem:[%s1164_s14 + $0xa8] sm:$0xff]  ;;  %v412_v41 = vld [vmem:[%s1159_s11 + $0xb0] sm:$0xff] }
  0xf1   : > { %v848_v44 = vadd.f32 %v847_v36, %v784_v31  ;;  %v787_v54 = vsel %vm723_vm12, %v591_v38, 0.0  ;;  %v660_v57 = vadd.s32 104, %v1185_v34  ;;  %vm725_vm14 = vcmp.lt.s32.totalorder %v658_v42, %v1192_v43  ;;  %v476_v42 = vld [vmem:[%s1164_s14 + $0xb0] sm:$0xff] }
  0xf2   : > { %v532_v59 = vsub.f32 %v404_v48, %v468_v49  ;;  %v594_v60 = vand.u32 2147483647, %v530_v45  ;;  %v788_v61 = vsel %vm724_vm13, %v592_v46, 0.0  ;;  %v661_v0 = vadd.s32 112, %v1185_v34  ;;  %v413_v49 = vld [vmem:[%s1159_s11 + $0xb8] sm:$0xff] }
  0xf3   : > { %v849_v51 = vadd.f32 %v848_v44, %v785_v39  ;;  %vm726_vm15 = vcmp.lt.s32.totalorder %v659_v50, %v1192_v43  ;;  %v533_v2 = vsub.f32 %v405_v55, %v469_v56  ;;  %v595_v3 = vand.u32 2147483647, %v531_v52  ;;  %v477_v50 = vld [vmem:[%s1164_s14 + $0xb8] sm:$0xff]  ;;  %v414_v56 = vld [vmem:[%s1159_s11 + $0xc0] sm:$0xff] }
  0xf4   : > { %v789_v4 = vsel %vm725_vm14, %v593_v53, 0.0  ;;  %v662_v7 = vadd.s32 120, %v1185_v34  ;;  %vm727_vm0 = vcmp.lt.s32.totalorder %v660_v57, %v1192_v43  ;;  %v534_v9 = vsub.f32 %v406_v62, %v470_v63  ;;  %v478_v57 = vld [vmem:[%s1164_s14 + $0xc0] sm:$0xff]  ;;  %v415_v63 = vld [vmem:[%s1159_s11 + $0xc8] sm:$0xff] }
  0xf5   : > { %v850_v58 = vadd.f32 %v849_v51, %v786_v47  ;;  %v596_v10 = vand.u32 2147483647, %v532_v59  ;;  %v790_v11 = vsel %vm726_vm15, %v594_v60, 0.0  ;;  %v663_v14 = vadd.s32 128, %v1185_v34 }
  0xf6   : > { %vm728_vm1 = vcmp.lt.s32.totalorder %v661_v0, %v1192_v43  ;;  %v535_v16 = vsub.f32 %v407_v5, %v471_v6  ;;  %v597_v17 = vand.u32 2147483647, %v533_v2  ;;  %v791_v18 = vsel %vm727_vm0, %v595_v3, 0.0  ;;  %v479_v0 = vld [vmem:[%s1164_s14 + $0xc8] sm:$0xff]  ;;  %v416_v6 = vld [vmem:[%s1159_s11 + $0xd0] sm:$0xff] }
  0xf7   : > { %v851_v1 = vadd.f32 %v850_v58, %v787_v54  ;;  %v664_v21 = vadd.s32 136, %v1185_v34  ;;  %vm729_vm2 = vcmp.lt.s32.totalorder %v662_v7, %v1192_v43  ;;  %v536_v23 = vsub.f32 %v408_v12, %v472_v13  ;;  %v480_v7 = vld [vmem:[%s1164_s14 + $0xd0] sm:$0xff]  ;;  %v417_v13 = vld [vmem:[%s1159_s11 + $0xd8] sm:$0xff] }
  0xf8   : > { %v598_v24 = vand.u32 2147483647, %v534_v9  ;;  %v792_v25 = vsel %vm728_vm1, %v596_v10, 0.0  ;;  %v665_v28 = vadd.s32 144, %v1185_v34  ;;  %vm730_vm3 = vcmp.lt.s32.totalorder %v663_v14, %v1192_v43  ;;  %v481_v14 = vld [vmem:[%s1164_s14 + $0xd8] sm:$0xff] }
  0xf9   : > { %v852_v8 = vadd.f32 %v851_v1, %v788_v61  ;;  %v537_v30 = vsub.f32 %v409_v19, %v473_v20  ;;  %v599_v31 = vand.u32 2147483647, %v535_v16  ;;  %v793_v32 = vsel %vm729_vm2, %v597_v17, 0.0  ;;  %v418_v20 = vld [vmem:[%s1159_s11 + $0xe0] sm:$0xff] }
  0xfa   : > { %v666_v36 = vadd.s32 152, %v1185_v34  ;;  %vm731_vm4 = vcmp.lt.s32.totalorder %v664_v21, %v1192_v43  ;;  %v538_v38 = vsub.f32 %v410_v26, %v474_v27  ;;  %v600_v39 = vand.u32 2147483647, %v536_v23  ;;  %v482_v21 = vld [vmem:[%s1164_s14 + $0xe0] sm:$0xff]  ;;  %v419_v27 = vld [vmem:[%s1159_s11 + $0xe8] sm:$0xff] }
  0xfb   : > { %v853_v15 = vadd.f32 %v852_v8, %v789_v4  ;;  %v794_v40 = vsel %vm730_vm3, %v598_v24, 0.0  ;;  %v667_v44 = vadd.s32 160, %v1185_v34  ;;  %vm732_vm5 = vcmp.lt.s32.totalorder %v665_v28, %v1192_v43  ;;  %v483_v28 = vld [vmem:[%s1164_s14 + $0xe8] sm:$0xff] }
  0xfc   : > { %v539_v46 = vsub.f32 %v411_v33, %v475_v35  ;;  %v601_v47 = vand.u32 2147483647, %v537_v30  ;;  %v795_v48 = vsel %vm731_vm4, %v599_v31, 0.0  ;;  %v668_v51 = vadd.s32 168, %v1185_v34  ;;  %v420_v35 = vld [vmem:[%s1159_s11 + $0xf0] sm:$0xff] }
  0xfd   : > { %v854_v22 = vadd.f32 %v853_v15, %v790_v11  ;;  %vm733_vm6 = vcmp.lt.s32.totalorder %v666_v36, %v1192_v43  ;;  %v540_v53 = vsub.f32 %v412_v41, %v476_v42  ;;  %v602_v54 = vand.u32 2147483647, %v538_v38  ;;  %v484_v36 = vld [vmem:[%s1164_s14 + $0xf0] sm:$0xff]  ;;  %v421_v42 = vld [vmem:[%s1159_s11 + $0xf8] sm:$0xff] }
  0xfe   : > { %v796_v55 = vsel %vm732_vm5, %v600_v39, 0.0  ;;  %v669_v58 = vadd.s32 176, %v1185_v34  ;;  %vm734_vm7 = vcmp.lt.s32.totalorder %v667_v44, %v1192_v43  ;;  %v541_v60 = vsub.f32 %v413_v49, %v477_v50  ;;  %v485_v44 = vld [vmem:[%s1164_s14 + $0xf8] sm:$0xff]  ;;  %v422_v50 = vld [vmem:[%s1159_s11 + $0x100] sm:$0xff] }
  0xff   : > { %v855_v29 = vadd.f32 %v854_v22, %v791_v18  ;;  %v603_v61 = vand.u32 2147483647, %v539_v46  ;;  %v797_v62 = vsel %vm733_vm6, %v601_v47, 0.0  ;;  %v670_v1 = vadd.s32 184, %v1185_v34 }
 0x100   : > { %vm735_vm8 = vcmp.lt.s32.totalorder %v668_v51, %v1192_v43  ;;  %v542_v3 = vsub.f32 %v414_v56, %v478_v57  ;;  %v604_v4 = vand.u32 2147483647, %v540_v53  ;;  %v798_v5 = vsel %vm734_vm7, %v602_v54, 0.0  ;;  %v486_v51 = vld [vmem:[%s1164_s14 + $0x100] sm:$0xff]  ;;  %v423_v57 = vld [vmem:[%s1159_s11 + $0x108] sm:$0xff] }
 0x101   : > { %v856_v37 = vadd.f32 %v855_v29, %v792_v25  ;;  %v671_v8 = vadd.s32 192, %v1185_v34  ;;  %vm736_vm9 = vcmp.lt.s32.totalorder %v669_v58, %v1192_v43  ;;  %v543_v10 = vsub.f32 %v415_v63, %v479_v0  ;;  %v487_v58 = vld [vmem:[%s1164_s14 + $0x108] sm:$0xff]  ;;  %v424_v0 = vld [vmem:[%s1159_s11 + $0x110] sm:$0xff] }
 0x102   : > { %v605_v11 = vand.u32 2147483647, %v541_v60  ;;  %v799_v12 = vsel %vm735_vm8, %v603_v61, 0.0  ;;  %v672_v15 = vadd.s32 200, %v1185_v34  ;;  %vm737_vm10 = vcmp.lt.s32.totalorder %v670_v1, %v1192_v43  ;;  %v488_v1 = vld [vmem:[%s1164_s14 + $0x110] sm:$0xff] }
 0x103   : > { %v857_v45 = vadd.f32 %v856_v37, %v793_v32  ;;  %v544_v17 = vsub.f32 %v416_v6, %v480_v7  ;;  %v606_v18 = vand.u32 2147483647, %v542_v3  ;;  %v800_v19 = vsel %vm736_vm9, %v604_v4, 0.0  ;;  %v425_v7 = vld [vmem:[%s1159_s11 + $0x118] sm:$0xff] }
 0x104   : > { %v673_v22 = vadd.s32 208, %v1185_v34  ;;  %vm738_vm11 = vcmp.lt.s32.totalorder %v671_v8, %v1192_v43  ;;  %v545_v24 = vsub.f32 %v417_v13, %v481_v14  ;;  %v607_v25 = vand.u32 2147483647, %v543_v10  ;;  %v489_v8 = vld [vmem:[%s1164_s14 + $0x118] sm:$0xff]  ;;  %v426_v14 = vld [vmem:[%s1159_s11 + $0x120] sm:$0xff] }
 0x105   : > { %v858_v52 = vadd.f32 %v857_v45, %v794_v40  ;;  %v801_v26 = vsel %vm737_vm10, %v605_v11, 0.0  ;;  %v674_v29 = vadd.s32 216, %v1185_v34  ;;  %vm739_vm12 = vcmp.lt.s32.totalorder %v672_v15, %v1192_v43  ;;  %v490_v15 = vld [vmem:[%s1164_s14 + $0x120] sm:$0xff] }
 0x106   : > { %v546_v31 = vsub.f32 %v418_v20, %v482_v21  ;;  %v608_v32 = vand.u32 2147483647, %v544_v17  ;;  %v802_v33 = vsel %vm738_vm11, %v606_v18, 0.0  ;;  %v675_v37 = vadd.s32 224, %v1185_v34  ;;  %v427_v21 = vld [vmem:[%s1159_s11 + $0x128] sm:$0xff] }
 0x107   : > { %v859_v59 = vadd.f32 %v858_v52, %v795_v48  ;;  %vm740_vm13 = vcmp.lt.s32.totalorder %v673_v22, %v1192_v43  ;;  %v547_v39 = vsub.f32 %v419_v27, %v483_v28  ;;  %v609_v40 = vand.u32 2147483647, %v545_v24  ;;  %v491_v22 = vld [vmem:[%s1164_s14 + $0x128] sm:$0xff]  ;;  %v428_v28 = vld [vmem:[%s1159_s11 + $0x130] sm:$0xff] }
 0x108   : > { %v803_v41 = vsel %vm739_vm12, %v607_v25, 0.0  ;;  %v676_v45 = vadd.s32 232, %v1185_v34  ;;  %vm741_vm14 = vcmp.lt.s32.totalorder %v674_v29, %v1192_v43  ;;  %v548_v47 = vsub.f32 %v420_v35, %v484_v36  ;;  %v492_v29 = vld [vmem:[%s1164_s14 + $0x130] sm:$0xff]  ;;  %v429_v36 = vld [vmem:[%s1159_s11 + $0x138] sm:$0xff] }
 0x109   : > { %v860_v2 = vadd.f32 %v859_v59, %v796_v55  ;;  %v610_v48 = vand.u32 2147483647, %v546_v31  ;;  %v804_v49 = vsel %vm740_vm13, %v608_v32, 0.0  ;;  %v677_v52 = vadd.s32 240, %v1185_v34 }
 0x10a   : > { %vm742_vm15 = vcmp.lt.s32.totalorder %v675_v37, %v1192_v43  ;;  %v549_v54 = vsub.f32 %v421_v42, %v485_v44  ;;  %v611_v55 = vand.u32 2147483647, %v547_v39  ;;  %v805_v56 = vsel %vm741_vm14, %v609_v40, 0.0  ;;  %v493_v37 = vld [vmem:[%s1164_s14 + $0x138] sm:$0xff]  ;;  %v430_v44 = vld [vmem:[%s1159_s11 + $0x140] sm:$0xff] }
 0x10b   : > { %v861_v9 = vadd.f32 %v860_v2, %v797_v62  ;;  %v678_v59 = vadd.s32 248, %v1185_v34  ;;  %vm743_vm0 = vcmp.lt.s32.totalorder %v676_v45, %v1192_v43  ;;  %v550_v61 = vsub.f32 %v422_v50, %v486_v51  ;;  %v494_v45 = vld [vmem:[%s1164_s14 + $0x140] sm:$0xff]  ;;  %v431_v51 = vld [vmem:[%s1159_s11 + $0x148] sm:$0xff] }
 0x10c   : > { %v612_v62 = vand.u32 2147483647, %v548_v47  ;;  %v806_v63 = vsel %vm742_vm15, %v610_v48, 0.0  ;;  %v679_v2 = vadd.s32 256, %v1185_v34  ;;  %vm744_vm1 = vcmp.lt.s32.totalorder %v677_v52, %v1192_v43  ;;  %v495_v52 = vld [vmem:[%s1164_s14 + $0x148] sm:$0xff] }
 0x10d   : > { %v862_v16 = vadd.f32 %v861_v9, %v798_v5  ;;  %v551_v4 = vsub.f32 %v423_v57, %v487_v58  ;;  %v613_v5 = vand.u32 2147483647, %v549_v54  ;;  %v807_v6 = vsel %vm743_vm0, %v611_v55, 0.0  ;;  %v432_v58 = vld [vmem:[%s1159_s11 + $0x150] sm:$0xff] }
 0x10e   : > { %v680_v9 = vadd.s32 264, %v1185_v34  ;;  %vm745_vm2 = vcmp.lt.s32.totalorder %v678_v59, %v1192_v43  ;;  %v552_v11 = vsub.f32 %v424_v0, %v488_v1  ;;  %v808_v13 = vsel %vm744_vm1, %v612_v62, 0.0  ;;  %v496_v59 = vld [vmem:[%s1164_s14 + $0x150] sm:$0xff]  ;;  %v433_v1 = vld [vmem:[%s1159_s11 + $0x158] sm:$0xff] }
 0x10f   : > { %v863_v23 = vadd.f32 %v862_v16, %v799_v12  ;;  %v614_v12 = vand.u32 2147483647, %v550_v61  ;;  %v681_v16 = vadd.s32 272, %v1185_v34  ;;  %vm746_vm3 = vcmp.lt.s32.totalorder %v679_v2, %v1192_v43  ;;  %v497_v2 = vld [vmem:[%s1164_s14 + $0x158] sm:$0xff] }
 0x110   : > { %v553_v18 = vsub.f32 %v425_v7, %v489_v8  ;;  %v809_v20 = vsel %vm745_vm2, %v613_v5, 0.0  ;;  %vm747_vm4 = vcmp.lt.s32.totalorder %v680_v9, %v1192_v43  ;;  %v554_v25 = vsub.f32 %v426_v14, %v490_v15  ;;  %v434_v8 = vld [vmem:[%s1159_s11 + $0x160] sm:$0xff]  ;;  %v435_v15 = vld [vmem:[%s1159_s11 + $0x168] sm:$0xff] }
 0x111   : > { %v864_v30 = vadd.f32 %v863_v23, %v800_v19  ;;  %v615_v19 = vand.u32 2147483647, %v551_v4  ;;  %v682_v23 = vadd.s32 280, %v1185_v34  ;;  %v810_v27 = vsel %vm746_vm3, %v614_v12, 0.0  ;;  %v498_v9 = vld [vmem:[%s1164_s14 + $0x160] sm:$0xff] }
 0x112   : > { %vm748_vm5 = vcmp.lt.s32.totalorder %v681_v16, %v1192_v43  ;;  %v555_v32 = vsub.f32 %v427_v21, %v491_v22  ;;  %v556_v40 = vsub.f32 %v428_v28, %v492_v29  ;;  %v557_v48 = vsub.f32 %v429_v36, %v493_v37  ;;  %v499_v16 = vld [vmem:[%s1164_s14 + $0x168] sm:$0xff]  ;;  %v436_v22 = vld [vmem:[%s1159_s11 + $0x170] sm:$0xff]  ;;  %v437_v29 = vld [vmem:[%s1159_s11 + $0x178] sm:$0xff] }
 0x113   : > { %v865_v38 = vadd.f32 %v864_v30, %v801_v26  ;;  %v616_v26 = vand.u32 2147483647, %v552_v11  ;;  %v683_v30 = vadd.s32 288, %v1185_v34  ;;  %v811_v35 = vsel %vm747_vm4, %v615_v19, 0.0  ;;  %v438_v37 = vld [vmem:[%s1159_s11 + $0x180] sm:$0xff] }
 0x114   : > { %vm749_vm6 = vcmp.lt.s32.totalorder %v682_v23, %v1192_v43  ;;  %v558_v55 = vsub.f32 %v430_v44, %v494_v45  ;;  %v559_v62 = vsub.f32 %v431_v51, %v495_v52  ;;  %v560_v5 = vsub.f32 %v432_v58, %v496_v59  ;;  %v500_v23 = vld [vmem:[%s1164_s14 + $0x170] sm:$0xff]  ;;  %v439_v45 = vld [vmem:[%s1159_s11 + $0x188] sm:$0xff]  ;;  %v441_v59 = vld [vmem:[%s1159_s11 + $0x198] sm:$0xff] }
 0x115   : > { %v866_v46 = vadd.f32 %v865_v38, %v802_v33  ;;  %v617_v33 = vand.u32 2147483647, %v553_v18  ;;  %v684_v38 = vadd.s32 296, %v1185_v34  ;;  %v812_v42 = vsel %vm748_vm5, %v616_v26, 0.0  ;;  %v440_v52 = vld [vmem:[%s1159_s11 + $0x190] sm:$0xff] }
 0x116   : > { %vm750_vm7 = vcmp.lt.s32.totalorder %v683_v30, %v1192_v43  ;;  %v561_v12 = vsub.f32 %v433_v1, %v497_v2  ;;  %v562_v19 = vsub.f32 %v434_v8, %v498_v9  ;;  %v563_v26 = vsub.f32 %v435_v15, %v499_v16  ;;  %v501_v30 = vld [vmem:[%s1164_s14 + $0x178] sm:$0xff]  ;;  %v442_v2 = vld [vmem:[%s1159_s11 + $0x1a0] sm:$0xff]  ;;  %v443_v9 = vld [vmem:[%s1159_s11 + $0x1a8] sm:$0xff] }
 0x117   : > { %v867_v53 = vadd.f32 %v866_v46, %v803_v41  ;;  %v618_v41 = vand.u32 2147483647, %v554_v25  ;;  %v685_v46 = vadd.s32 304, %v1185_v34  ;;  %v813_v50 = vsel %vm749_vm6, %v617_v33, 0.0  ;;  %v444_v16 = vld [vmem:[%s1159_s11 + $0x1b0] sm:$0xff] }
 0x118   : > { %vm751_vm8 = vcmp.lt.s32.totalorder %v684_v38, %v1192_v43  ;;  %v564_v33 = vsub.f32 %v436_v22, %v500_v23  ;;  %v502_v38 = vld [vmem:[%s1164_s14 + $0x180] sm:$0xff]  ;;  %v445_v23 = vld [vmem:[%s1159_s11 + $0x1b8] sm:$0xff] }
 0x119   : > { %v868_v60 = vadd.f32 %v867_v53, %v804_v49  ;;  %v619_v49 = vand.u32 2147483647, %v555_v32  ;;  %v686_v53 = vadd.s32 312, %v1185_v34  ;;  %v814_v57 = vsel %vm750_vm7, %v618_v41, 0.0 }
 0x11a   : > { %vm752_vm9 = vcmp.lt.s32.totalorder %v685_v46, %v1192_v43  ;;  %v565_v41 = vsub.f32 %v437_v29, %v501_v30  ;;  %v503_v46 = vld [vmem:[%s1164_s14 + $0x188] sm:$0xff]  ;;  %v446_v30 = vld [vmem:[%s1159_s11 + $0x1c0] sm:$0xff] }
 0x11b   : > { %v869_v3 = vadd.f32 %v868_v60, %v805_v56  ;;  %v620_v56 = vand.u32 2147483647, %v556_v40  ;;  %v687_v60 = vadd.s32 320, %v1185_v34  ;;  %v815_v0 = vsel %vm751_vm8, %v619_v49, 0.0 }
 0x11c   : > { %vm753_vm10 = vcmp.lt.s32.totalorder %v686_v53, %v1192_v43  ;;  %v566_v49 = vsub.f32 %v438_v37, %v502_v38  ;;  %v504_v53 = vld [vmem:[%s1164_s14 + $0x190] sm:$0xff]  ;;  %v447_v38 = vld [vmem:[%s1159_s11 + $0x1c8] sm:$0xff] }
 0x11d   : > { %v870_v10 = vadd.f32 %v869_v3, %v806_v63  ;;  %v621_v63 = vand.u32 2147483647, %v557_v48  ;;  %v688_v3 = vadd.s32 328, %v1185_v34  ;;  %v816_v7 = vsel %vm752_vm9, %v620_v56, 0.0 }
 0x11e   : > { %vm754_vm11 = vcmp.lt.s32.totalorder %v687_v60, %v1192_v43  ;;  %v567_v56 = vsub.f32 %v439_v45, %v503_v46  ;;  %v505_v60 = vld [vmem:[%s1164_s14 + $0x198] sm:$0xff]  ;;  %v448_v46 = vld [vmem:[%s1159_s11 + $0x1d0] sm:$0xff] }
 0x11f   : > { %v871_v17 = vadd.f32 %v870_v10, %v807_v6  ;;  %v622_v6 = vand.u32 2147483647, %v558_v55  ;;  %v689_v10 = vadd.s32 336, %v1185_v34  ;;  %v817_v14 = vsel %vm753_vm10, %v621_v63, 0.0 }
 0x120   : > { %vm755_vm12 = vcmp.lt.s32.totalorder %v688_v3, %v1192_v43  ;;  %v568_v63 = vsub.f32 %v440_v52, %v504_v53  ;;  %v506_v3 = vld [vmem:[%s1164_s14 + $0x1a0] sm:$0xff]  ;;  %v449_v53 = vld [vmem:[%s1159_s11 + $0x1d8] sm:$0xff] }
 0x121   : > { %v872_v24 = vadd.f32 %v871_v17, %v808_v13  ;;  %v623_v13 = vand.u32 2147483647, %v559_v62  ;;  %v690_v17 = vadd.s32 344, %v1185_v34  ;;  %v818_v21 = vsel %vm754_vm11, %v622_v6, 0.0 }
 0x122   : > { %vm756_vm13 = vcmp.lt.s32.totalorder %v689_v10, %v1192_v43  ;;  %v569_v6 = vsub.f32 %v441_v59, %v505_v60  ;;  %v507_v10 = vld [vmem:[%s1164_s14 + $0x1a8] sm:$0xff]  ;;  %v450_v60 = vld [vmem:[%s1159_s11 + $0x1e0] sm:$0xff] }
 0x123   : > { %v873_v31 = vadd.f32 %v872_v24, %v809_v20  ;;  %v624_v20 = vand.u32 2147483647, %v560_v5  ;;  %v691_v24 = vadd.s32 352, %v1185_v34  ;;  %v819_v28 = vsel %vm755_vm12, %v623_v13, 0.0 }
 0x124   : > { %vm757_vm14 = vcmp.lt.s32.totalorder %v690_v17, %v1192_v43  ;;  %v570_v13 = vsub.f32 %v442_v2, %v506_v3  ;;  %v508_v17 = vld [vmem:[%s1164_s14 + $0x1b0] sm:$0xff]  ;;  %v451_v3 = vld [vmem:[%s1159_s11 + $0x1e8] sm:$0xff] }
 0x125   : > { %v874_v39 = vadd.f32 %v873_v31, %v810_v27  ;;  %v625_v27 = vand.u32 2147483647, %v561_v12  ;;  %v692_v31 = vadd.s32 360, %v1185_v34  ;;  %v820_v36 = vsel %vm756_vm13, %v624_v20, 0.0 }
 0x126   : > { %vm758_vm15 = vcmp.lt.s32.totalorder %v691_v24, %v1192_v43  ;;  %v571_v20 = vsub.f32 %v443_v9, %v507_v10  ;;  %v509_v24 = vld [vmem:[%s1164_s14 + $0x1b8] sm:$0xff]  ;;  %v452_v10 = vld [vmem:[%s1159_s11 + $0x1f0] sm:$0xff] }
 0x127   : > { %v875_v47 = vadd.f32 %v874_v39, %v811_v35  ;;  %v626_v35 = vand.u32 2147483647, %v562_v19  ;;  %v693_v39 = vadd.s32 368, %v1185_v34  ;;  %v821_v44 = vsel %vm757_vm14, %v625_v27, 0.0 }
 0x128   : > { %vm759_vm0 = vcmp.lt.s32.totalorder %v692_v31, %v1192_v43  ;;  %v572_v27 = vsub.f32 %v444_v16, %v508_v17  ;;  %v510_v31 = vld [vmem:[%s1164_s14 + $0x1c0] sm:$0xff]  ;;  %v453_v17 = vld [vmem:[%s1159_s11 + $0x1f8] sm:$0xff]  ;;  %s1014_s11 = sld [smem:[#allocation4 + $0x1]] (!%p1013_p8) }
 0x129   : > { %v876_v54 = vadd.f32 %v875_v47, %v812_v42  ;;  %v627_v42 = vand.u32 2147483647, %v563_v26  ;;  %v694_v47 = vadd.s32 376, %v1185_v34  ;;  %v822_v51 = vsel %vm758_vm15, %v626_v35, 0.0 }
 0x12a   : > { %vm760_vm1 = vcmp.lt.s32.totalorder %v693_v39, %v1192_v43  ;;  %v573_v35 = vsub.f32 %v445_v23, %v509_v24  ;;  %v511_v39 = vld [vmem:[%s1164_s14 + $0x1c8] sm:$0xff]  ;;  %v709_v24 = vadd.s32 496, %v1185_v34 }
 0x12b   : > { %v877_v61 = vadd.f32 %v876_v54, %v813_v50  ;;  %v628_v50 = vand.u32 2147483647, %v564_v33  ;;  %v695_v54 = vadd.s32 384, %v1185_v34  ;;  %v823_v58 = vsel %vm759_vm0, %v627_v42, 0.0 }
 0x12c   : > { %vm761_vm2 = vcmp.lt.s32.totalorder %v694_v47, %v1192_v43  ;;  %v574_v42 = vsub.f32 %v446_v30, %v510_v31  ;;  %v512_v47 = vld [vmem:[%s1164_s14 + $0x1d0] sm:$0xff] }
 0x12d   : > { %v878_v4 = vadd.f32 %v877_v61, %v814_v57  ;;  %v629_v57 = vand.u32 2147483647, %v565_v41  ;;  %v696_v61 = vadd.s32 392, %v1185_v34  ;;  %v824_v1 = vsel %vm760_vm1, %v628_v50, 0.0 }
 0x12e   : > { %vm762_vm3 = vcmp.lt.s32.totalorder %v695_v54, %v1192_v43  ;;  %v575_v50 = vsub.f32 %v447_v38, %v511_v39  ;;  %v513_v54 = vld [vmem:[%s1164_s14 + $0x1d8] sm:$0xff]  ;;  %vm776_vm1 = vcmp.lt.s32.totalorder %v709_v24, %v1192_v43 }
 0x12f   : > { %v879_v11 = vadd.f32 %v878_v4, %v815_v0  ;;  %v630_v0 = vand.u32 2147483647, %v566_v49  ;;  %v697_v4 = vadd.s32 400, %v1185_v34  ;;  %v825_v8 = vsel %vm761_vm2, %v629_v57, 0.0 }
 0x130   : > { %vm763_vm4 = vcmp.lt.s32.totalorder %v696_v61, %v1192_v43  ;;  %v576_v57 = vsub.f32 %v448_v46, %v512_v47  ;;  %v514_v61 = vld [vmem:[%s1164_s14 + $0x1e0] sm:$0xff] }
 0x131   : > { %v880_v18 = vadd.f32 %v879_v11, %v816_v7  ;;  %v631_v7 = vand.u32 2147483647, %v567_v56  ;;  %v698_v11 = vadd.s32 408, %v1185_v34  ;;  %v826_v15 = vsel %vm762_vm3, %v630_v0, 0.0 }
 0x132   : > { %vm764_vm5 = vcmp.lt.s32.totalorder %v697_v4, %v1192_v43  ;;  %v577_v0 = vsub.f32 %v449_v53, %v513_v54  ;;  %v515_v4 = vld [vmem:[%s1164_s14 + $0x1e8] sm:$0xff] }
 0x133   : > { %v881_v25 = vadd.f32 %v880_v18, %v817_v14  ;;  %v632_v14 = vand.u32 2147483647, %v568_v63  ;;  %v699_v18 = vadd.s32 416, %v1185_v34  ;;  %v827_v22 = vsel %vm763_vm4, %v631_v7, 0.0 }
 0x134   : > { %vm765_vm6 = vcmp.lt.s32.totalorder %v698_v11, %v1192_v43  ;;  %v578_v7 = vsub.f32 %v450_v60, %v514_v61  ;;  %v516_v11 = vld [vmem:[%s1164_s14 + $0x1f0] sm:$0xff] }
 0x135   : > { %v882_v32 = vadd.f32 %v881_v25, %v818_v21  ;;  %v633_v21 = vand.u32 2147483647, %v569_v6  ;;  %v700_v25 = vadd.s32 424, %v1185_v34  ;;  %v828_v29 = vsel %vm764_vm5, %v632_v14, 0.0 }
 0x136   : > { %vm766_vm7 = vcmp.lt.s32.totalorder %v699_v18, %v1192_v43  ;;  %v579_v14 = vsub.f32 %v451_v3, %v515_v4  ;;  %v517_v18 = vld [vmem:[%s1164_s14 + $0x1f8] sm:$0xff] }
 0x137   : > { %v883_v40 = vadd.f32 %v882_v32, %v819_v28  ;;  %v634_v28 = vand.u32 2147483647, %v570_v13  ;;  %v701_v32 = vadd.s32 432, %v1185_v34  ;;  %v829_v37 = vsel %vm765_vm6, %v633_v21, 0.0 }
 0x138   : > { %vm767_vm8 = vcmp.lt.s32.totalorder %v700_v25, %v1192_v43  ;;  %v580_v21 = vsub.f32 %v452_v10, %v516_v11 }
 0x139   : > { %v884_v48 = vadd.f32 %v883_v40, %v820_v36  ;;  %v635_v36 = vand.u32 2147483647, %v571_v20  ;;  %v702_v40 = vadd.s32 440, %v1185_v34  ;;  %v830_v45 = vsel %vm766_vm7, %v634_v28, 0.0 }
 0x13a   : > { %vm768_vm9 = vcmp.lt.s32.totalorder %v701_v32, %v1192_v43  ;;  %v644_v31 = vand.u32 2147483647, %v580_v21 }
 0x13b   : > { %v885_v55 = vadd.f32 %v884_v48, %v821_v44  ;;  %v636_v44 = vand.u32 2147483647, %v572_v27  ;;  %v703_v48 = vadd.s32 448, %v1185_v34  ;;  %v831_v52 = vsel %vm767_vm8, %v635_v36, 0.0 }
 0x13c   : > { %vm769_vm10 = vcmp.lt.s32.totalorder %v702_v40, %v1192_v43  ;;  %v643_v27 = vand.u32 2147483647, %v579_v14  ;;  %v840_v38 = vsel %vm776_vm1, %v644_v31, 0.0 }
 0x13d   : > { %v886_v62 = vadd.f32 %v885_v55, %v822_v51  ;;  %v637_v51 = vand.u32 2147483647, %v573_v35  ;;  %v704_v55 = vadd.s32 456, %v1185_v34  ;;  %v832_v59 = vsel %vm768_vm9, %v636_v44, 0.0 }
 0x13e   : > { %vm770_vm11 = vcmp.lt.s32.totalorder %v703_v48, %v1192_v43 }
 0x13f   : > { %v887_v5 = vadd.f32 %v886_v62, %v823_v58  ;;  %v638_v58 = vand.u32 2147483647, %v574_v42  ;;  %v705_v62 = vadd.s32 464, %v1185_v34  ;;  %v833_v2 = vsel %vm769_vm10, %v637_v51, 0.0  ;;  %v842_v42 = vld [vmem:[#allocation2] sm:$0xff] }
 0x140   : > { %vm771_vm12 = vcmp.lt.s32.totalorder %v704_v55, %v1192_v43 }
 0x141   : > { %v888_v12 = vadd.f32 %v887_v5, %v824_v1  ;;  %v639_v1 = vand.u32 2147483647, %v575_v50  ;;  %v706_v5 = vadd.s32 472, %v1185_v34  ;;  %v834_v9 = vsel %vm770_vm11, %v638_v58, 0.0 }
 0x142   : > { %vm772_vm13 = vcmp.lt.s32.totalorder %v705_v62, %v1192_v43 }
 0x143   : > { %v889_v19 = vadd.f32 %v888_v12, %v825_v8  ;;  %v640_v8 = vand.u32 2147483647, %v576_v57  ;;  %v707_v12 = vadd.s32 480, %v1185_v34  ;;  %v835_v16 = vsel %vm771_vm12, %v639_v1, 0.0 }
 0x144   : > { %vm773_vm14 = vcmp.lt.s32.totalorder %v706_v5, %v1192_v43 }
 0x145   : > { %v890_v26 = vadd.f32 %v889_v19, %v826_v15  ;;  %v641_v15 = vand.u32 2147483647, %v577_v0  ;;  %v708_v19 = vadd.s32 488, %v1185_v34  ;;  %v836_v23 = vsel %vm772_vm13, %v640_v8, 0.0 }
 0x146   : > { %vm774_vm15 = vcmp.lt.s32.totalorder %v707_v12, %v1192_v43 }
 0x147   : > { %v891_v33 = vadd.f32 %v890_v26, %v827_v22  ;;  %v642_v22 = vand.u32 2147483647, %v578_v7  ;;  %v581_v26 = vsub.f32 %v453_v17, %v517_v18  ;;  %v837_v28 = vsel %vm773_vm14, %v641_v15, 0.0 }
 0x148   : > { %vm775_vm0 = vcmp.lt.s32.totalorder %v708_v19, %v1192_v43 }
 0x149   : > { %v892_v41 = vadd.f32 %v891_v33, %v828_v29  ;;  %v710_v29 = vadd.s32 504, %v1185_v34  ;;  %v838_v32 = vsel %vm774_vm15, %v642_v22, 0.0  ;;  %v645_v35 = vand.u32 2147483647, %v581_v26 }
 0x14a   : > { %v839_v36 = vsel %vm775_vm0, %v643_v27, 0.0 }
 0x14b   : > { %v893_v49 = vadd.f32 %v892_v41, %v829_v37  ;;  %vm777_vm2 = vcmp.lt.s32.totalorder %v710_v29, %v1192_v43 }
 0x14c   : > { %v841_v40 = vsel %vm777_vm2, %v645_v35, 0.0 }
 0x14d   : > { %v894_v56 = vadd.f32 %v893_v49, %v830_v45 }
 0x14f   : > { %v895_v63 = vadd.f32 %v894_v56, %v831_v52 }
 0x151   : > { %v896_v6 = vadd.f32 %v895_v63, %v832_v59 }
 0x153   : > { %v897_v13 = vadd.f32 %v896_v6, %v833_v2 }
 0x155   : > { %v898_v20 = vadd.f32 %v897_v13, %v834_v9 }
 0x157   : > { %v899_v25 = vadd.f32 %v898_v20, %v835_v16 }
 0x159   : > { %v900_v30 = vadd.f32 %v899_v25, %v836_v23 }
 0x15b   : > { %v901_v33 = vadd.f32 %v900_v30, %v837_v28 }
 0x15d   : > { %v902_v37 = vadd.f32 %v901_v33, %v838_v32 }
 0x15f   : > { %v903_v39 = vadd.f32 %v902_v37, %v839_v36 }
 0x161   : > { %v904_v41 = vadd.f32 %v903_v39, %v840_v38 }
 0x163   : > { %v905_v44 = vadd.f32 %v904_v41, %v841_v40  ;;  %911 = sbr.rel (%p1013_p8) target bundleno = 550 (0x226), region = 60 }
 0x165   : > { %v906_v34 = vadd.f32 %v905_v44, %v842_v42 }
 0x167   : > { %907 = vst [vmem:[#allocation2] sm:$0xff] %v906_v34 }
 0x16e   : > { %v913_v45 = vld [vmem:[#allocation2] sm:$0xff] }
 0x16f   : > { %914 = vadd.xlane.f32.xlu0 %v913_v45 }
 0x1e2   : > { %v915_v46 = vpop.xlane.xlu0 %914 }
 0x1e3   : > { %v916_v47 = vrot.slane %v915_v46, 4 }
 0x1e5   : > { %v917_v48 = vadd.f32 %v916_v47, %v915_v46 }
 0x1e7   : > { %v918_v49 = vrot.slane %v917_v48, 2 }
 0x1e9   : > { %v919_v50 = vadd.f32 %v918_v49, %v917_v48 }
 0x1eb   : > { %v920_v43 = vrot.slane %v919_v50, 1 }
 0x1ed   : > { %v921_v51 = vadd.f32 %v920_v43, %v919_v50 }
 0x1ef   : > { %1023 = vpush %v921_v51 }
 0x220   : > { %s1024_s13 = spop %1023 }
 0x221   : > { %s924_s14 = smul.f32 %s1024_s13, %s1014_s11 }
 0x223   : > { %s925_s15 = sadd.f32 %s924_s14, %s912_s12 }
 0x225   : > { %927 = sst [smem:[#allocation7]] %s925_s15 }
 0x226 PF: > { %p1039_p9 = scmp.eq.s32.totalorder %s1146_s25, 1  ;;  %s934_s18 = sshll.u32 %s1456_s7, 4  ;;  %s935_s18 = int_to_ptr.hbm [resolvable:$true] %s934_s18 }
 0x227   : > { %s1099_s19 = smov [#allocation7]  }
 0x228   : > { %1030 = dma.smem_to_hbm (%p1039_p9), %s1099_s19, 16, %s935_s18, [#allocation5]  }
 0x229   : > { %1090 = dma.done.wait (%p1039_p9), [#allocation5], 16  }
 0x22a   : > { %1092 = vsyncadd (%p1039_p9), [#allocation5], 4294967280 }
 0x22b   : > { %943 = sfence }
 0x22c PF: > { %s19_s24 = sadd.s32 1, %s1095_s24  }
 0x22d   : > { %p16_p10 = scmp.ge.s32.totalorder %s19_s24, 4  }
 0x22f   :  { %18 = sbr.rel (!%p16_p10) target bundleno = 2 (0x2), region = 93 }
 0x234   :  { %949 = vsyncpa [#allocation5], 1 }
 0x235   :  { %951 = vsyncpa [#allocation5 + $0x1], 1 }
 0x236   :  { %952 = vsyncpa [#allocation6], 1 }
 0x237   :  { %954 = vsyncpa [#allocation6 + $0x1], 1 }

</bundles_post_ra>
